<compile_context>
chip_gen: v5e
topology: v5e:2x2
jax: 0.10.0
libtpu: 0.0.40
codegen_flags: <defaults>
</compile_context>

<pallas_src>
import functools

import jax
import jax.numpy as jnp
import numpy as np
from jax.experimental import pallas as pl
from jax.experimental.pallas import tpu as pltpu


# ----------------------------------------------------------------------------
# Kernel 1: batched input projection  gx = x @ W_in + b_in   (all timesteps at once)
# ----------------------------------------------------------------------------
def _in_proj_kernel(x_ref, w_ref, b_ref, o_ref):
    o_ref[...] = (jnp.dot(x_ref[...], w_ref[...],
                          preferred_element_type=jnp.float32)
                  + b_ref[...]).astype(o_ref.dtype)


def _input_projection(x, w, b, *, row_tile=256):
    """x: (M, E), w: (E, N), b: (N,)  ->  (M, N) float32."""
    M, E = x.shape
    N = w.shape[1]
    tm = min(row_tile, M)
    if M % tm != 0:          # keep blocks exact (demo-sized problems)
        tm = M
    b2 = b.reshape(1, N)
    return pl.pallas_call(
        _in_proj_kernel,
        out_shape=jax.ShapeDtypeStruct((M, N), jnp.float32),
        grid_spec=pltpu.PrefetchScalarGridSpec(
            num_scalar_prefetch=0,
            grid=(M // tm,),
            in_specs=[pl.BlockSpec((tm, E), lambda i: (i, 0)),
                      pl.BlockSpec((E, N), lambda i: (0, 0),
                                   pipeline_mode=pl.Buffered(1)),
                      pl.BlockSpec((1, N), lambda i: (0, 0),
                                   pipeline_mode=pl.Buffered(1))],
            out_specs=pl.BlockSpec((tm, N), lambda i: (i, 0))),
        compiler_params=pltpu.CompilerParams(
            dimension_semantics=("parallel",),
            vmem_limit_bytes=32 * 1024 * 1024),
    )(x, w, b2)


# ----------------------------------------------------------------------------
# Kernel 2: time-blocked bidirectional GRU recurrence.
# One grid step = K timesteps.  Both directions are fused: the carried hidden
# state is (B, 2H) = [h_fwd | h_bwd], the recurrent weight is block-diagonal
# (2H, 6H) with gate-major columns [r_f r_b z_f z_b n_f n_b], so each step is
# a single MXU matmul + joint elementwise gates for both directions.
# Forward reads precomputed gx at time k*K+i, backward at time T-1-(k*K+i).
# ----------------------------------------------------------------------------
def _bigru_recurrent_kernel(gxf_ref, gxb_ref, whh_ref, bhh_ref,
                            outf_ref, outb_ref, hfin_ref, h_scr):
    k = pl.program_id(0)

    @pl.when(k == 0)
    def _():
        h_scr[...] = jnp.zeros_like(h_scr)

    K = gxf_ref.shape[0]
    B = h_scr.shape[0]
    H2 = h_scr.shape[1]          # 2 * H
    H = H2 // 2
    G = 3 * H2                   # 6 * H

    # constant-index blocks: loaded once per grid step, hoisted out of the loop
    whh = whh_ref[...]                                        # (2H, 6H)
    bhh = jnp.broadcast_to(bhh_ref[...], (B, G))              # (B, 6H)
    col = jax.lax.broadcasted_iota(jnp.int32, (B, G), 1)
    is_fwd_col = (col % H2) < H                               # forward-direction columns

    def step(i, h):
        # recurrent (hidden-to-hidden) pre-activations, both directions in one matmul
        gh = jnp.dot(h, whh, preferred_element_type=jnp.float32) + bhh
        # precomputed input pre-activations: fwd columns from time k*K+i,
        # bwd columns from time T-1-(k*K+i) (reversed block + reversed row)
        gx = jnp.where(is_fwd_col, gxf_ref[i], gxb_ref[K - 1 - i])
        r = jax.nn.sigmoid(gx[:, 0:H2] + gh[:, 0:H2])
        z = jax.nn.sigmoid(gx[:, H2:2 * H2] + gh[:, H2:2 * H2])
        n = jnp.tanh(gx[:, 2 * H2:] + r * gh[:, 2 * H2:])
        h_new = (1.0 - z) * n + z * h
        outf_ref[i] = h_new[:, :H].astype(outf_ref.dtype)
        outb_ref[K - 1 - i] = h_new[:, H:].astype(outb_ref.dtype)
        return h_new

    h_fin = jax.lax.fori_loop(0, K, step, h_scr[...], unroll=True)
    h_scr[...] = h_fin

    @pl.when(k == pl.num_programs(0) - 1)
    def _():
        # torch: hidden[0] = fwd state after x[T-1], hidden[1] = bwd state after x[0]
        hfin_ref[0] = h_fin[:, :H].astype(hfin_ref.dtype)
        hfin_ref[1] = h_fin[:, H:].astype(hfin_ref.dtype)


# ----------------------------------------------------------------------------
# Host-side wrappers
# ----------------------------------------------------------------------------
def _gate_major_concat(f, b, H):
    """[r z n] per direction -> combined [r_f r_b z_f z_b n_f n_b] along last axis."""
    parts = []
    for g in range(3):
        parts.append(f[..., g * H:(g + 1) * H])
        parts.append(b[..., g * H:(g + 1) * H])
    return jnp.concatenate(parts, axis=-1)


def _pick_time_block(T, max_block=32):
    for k in range(min(T, max_block), 0, -1):
        if T % k == 0:
            return k
    return 1


def bigru_pallas(emb, wih_f, whh_f, bih_f, bhh_f,
                 wih_b, whh_b, bih_b, bhh_b, *, block_t=None):
    """emb: (T, B, E) f32.  Weights in torch layout (3H,E)/(3H,H), biases (3H,)."""
    T, B, E = emb.shape
    H = whh_f.shape[1]

    # --- parameter re-layout (cheap glue, once per call) ---------------------
    w_in = _gate_major_concat(wih_f.T, wih_b.T, H)             # (E, 6H)
    b_in = _gate_major_concat(bih_f, bih_b, H)                 # (6H,)
    zf = jnp.zeros_like(whh_f.T)                               # (H, 3H)
    zb = jnp.zeros_like(whh_b.T)
    whh_bd = _gate_major_concat(                               # block-diagonal (2H, 6H)
        jnp.concatenate([whh_f.T, zf], axis=0),
        jnp.concatenate([zb, whh_b.T], axis=0),
        H)
    b_hh = _gate_major_concat(bhh_f, bhh_b, H).reshape(1, 6 * H)

    # --- opt 1: hoist the input-to-hidden matmul out of the recurrence -------
    gx = _input_projection(emb.reshape(T * B, E), w_in, b_in)
    gx = gx.reshape(T, B, 6 * H)

    # --- opt 2: time-blocked recurrent kernel --------------------------------
    if block_t is None:
        block_t = _pick_time_block(T)
    assert T % block_t == 0, "block_t must divide T"
    K = block_t
    Tb = T // K

    gx_fwd_spec = pl.BlockSpec((K, B, 6 * H), lambda k: (k, 0, 0))
    gx_bwd_spec = pl.BlockSpec((K, B, 6 * H), lambda k: (Tb - 1 - k, 0, 0))
    whh_spec = pl.BlockSpec((2 * H, 6 * H), lambda k: (0, 0),
                            pipeline_mode=pl.Buffered(1))       # opt 3
    bhh_spec = pl.BlockSpec((1, 6 * H), lambda k: (0, 0),
                            pipeline_mode=pl.Buffered(1))
    out_f_spec = pl.BlockSpec((K, B, H), lambda k: (k, 0, 0))
    out_b_spec = pl.BlockSpec((K, B, H), lambda k: (Tb - 1 - k, 0, 0))
    hfin_spec = pl.BlockSpec((2, B, H), lambda k: (0, 0, 0))

    out_f, out_b, h_n = pl.pallas_call(
        _bigru_recurrent_kernel,
        out_shape=(jax.ShapeDtypeStruct((T, B, H), jnp.float32),
                   jax.ShapeDtypeStruct((T, B, H), jnp.float32),
                   jax.ShapeDtypeStruct((2, B, H), jnp.float32)),
        grid_spec=pltpu.PrefetchScalarGridSpec(
            num_scalar_prefetch=0,
            grid=(Tb,),
            in_specs=[gx_fwd_spec, gx_bwd_spec, whh_spec, bhh_spec],
            out_specs=[out_f_spec, out_b_spec, hfin_spec],
            scratch_shapes=[pltpu.VMEM((B, 2 * H), jnp.float32)]),
        compiler_params=pltpu.CompilerParams(
            dimension_semantics=("arbitrary",),   # sequential recurrence over time blocks
            vmem_limit_bytes=32 * 1024 * 1024),
    )(gx, gx, whh_bd, b_hh)
    return out_f, out_b, h_n


def encoder_forward(src, params, *, block_t=None):
    """src: (T, B) int32 ids.  Returns (outputs (T,B,H), hidden (2,B,H))."""
    emb = params["embed"][src]                       # embedding gather (glue)
    out_f, out_b, h_n = bigru_pallas(
        emb,
        params["wih_f"], params["whh_f"], params["bih_f"], params["bhh_f"],
        params["wih_b"], params["whh_b"], params["bih_b"], params["bhh_b"],
        block_t=block_t)
    # = outputs[..., :H] + outputs[..., H:]   (fuses with downstream consumer under jit)
    outputs = out_f + out_b
    return outputs, h_n
    # TODO(synk): at production sizes, cast matmul inputs to bf16 (opt 6) and pad H to a
    # multiple of 128 / B to a multiple of 8 for lane/sublane-dense stores (opt 5).


# ----------------------------------------------------------------------------
# Pure-JAX reference (correctness check)
# ----------------------------------------------------------------------------
def _gru_dir_ref(xs, wih, whh, bih, bhh, H):
    def step(h, x):
        gx = x @ wih.T + bih
        gh = h @ whh.T + bhh
        r = jax.nn.sigmoid(gx[:, :H] + gh[:, :H])
        z = jax.nn.sigmoid(gx[:, H:2 * H] + gh[:, H:2 * H])
        n = jnp.tanh(gx[:, 2 * H:] + r * gh[:, 2 * H:])
        h_new = (1.0 - z) * n + z * h
        return h_new, h_new
    h0 = jnp.zeros((xs.shape[1], H), jnp.float32)
    h_last, ys = jax.lax.scan(step, h0, xs)
    return ys, h_last


def encoder_forward_ref(src, params):
    H = params["whh_f"].shape[1]
    emb = params["embed"][src]
    yf, hf = _gru_dir_ref(emb, params["wih_f"], params["whh_f"],
                          params["bih_f"], params["bhh_f"], H)
    yb_rev, hb = _gru_dir_ref(emb[::-1], params["wih_b"], params["whh_b"],
                              params["bih_b"], params["bhh_b"], H)
    yb = yb_rev[::-1]
    return yf + yb, jnp.stack([hf, hb], axis=0)


# ----------------------------------------------------------------------------
# Deterministic parameter init (PyTorch-style shapes; synthetic values)
# ----------------------------------------------------------------------------
def init_params(key, input_size, embed_size, hidden_size):
    ks = jax.random.split(key, 9)
    k = 1.0 / np.sqrt(hidden_size)
    u = lambda kk, shape: jax.random.uniform(kk, shape, jnp.float32, -k, k)
    return {
        "embed": jax.random.normal(ks[0], (input_size, embed_size), jnp.float32),
        "wih_f": u(ks[1], (3 * hidden_size, embed_size)),
        "whh_f": u(ks[2], (3 * hidden_size, hidden_size)),
        "bih_f": u(ks[3], (3 * hidden_size,)),
        "bhh_f": u(ks[4], (3 * hidden_size,)),
        "wih_b": u(ks[5], (3 * hidden_size, embed_size)),
        "whh_b": u(ks[6], (3 * hidden_size, hidden_size)),
        "bih_b": u(ks[7], (3 * hidden_size,)),
        "bhh_b": u(ks[8], (3 * hidden_size,)),
    }


if __name__ == "__main__":
    input_size = 16     # vocab
    embed_size = 32
    hidden_size = 32
    T, B = 8, 2

    key = jax.random.PRNGKey(0)
    kp, ks = jax.random.split(key)
    params = init_params(kp, input_size, embed_size, hidden_size)
    src = jax.random.randint(ks, (T, B), 0, input_size, dtype=jnp.int32)

    fwd = jax.jit(functools.partial(encoder_forward, block_t=4))  # 2 time blocks of 4
    outputs, hidden = jax.block_until_ready(fwd(src, params))

    out_ref, hid_ref = jax.block_until_ready(encoder_forward_ref(src, params))
    np.testing.assert_allclose(np.asarray(outputs), np.asarray(out_ref),
                               rtol=1e-4, atol=1e-5)
    np.testing.assert_allclose(np.asarray(hidden), np.asarray(hid_ref),
                               rtol=1e-4, atol=1e-5)

    assert outputs.shape == (T, B, hidden_size)
    assert hidden.shape == (2, B, hidden_size)
    print("KERNEL_OK")
</pallas_src>

<mosaic_0001>
module attributes {stable_mosaic.version = 11 : i64} {
  func.func @_in_proj_kernel(%arg0: i32, %arg1: memref<16x32xf32, #tpu.memory_space<vmem>>, %arg2: memref<32x192xf32, #tpu.memory_space<vmem>>, %arg3: memref<1x192xf32, #tpu.memory_space<vmem>>, %arg4: memref<16x192xf32, #tpu.memory_space<vmem>>) attributes {dimension_semantics = [#tpu.dimension_semantics<parallel>], iteration_bounds = array<i64: 1>, scalar_prefetch = 0 : i64, scratch_operands = 0 : i64, tpu.core_type = #tpu.core_type<tc>, window_params = [{transform_indices = @transform_0, window_bounds = array<i64: 16, 32>}, {pipeline_mode = #tpu.pipeline_mode<synchronous>, transform_indices = @transform_1, window_bounds = array<i64: 32, 192>}, {pipeline_mode = #tpu.pipeline_mode<synchronous>, transform_indices = @transform_2, window_bounds = array<i64: 1, 192>}, {transform_indices = @transform_3, window_bounds = array<i64: 16, 192>}]} {
    %c0 = arith.constant 0 : index
    %c0_0 = arith.constant 0 : index
    %0 = vector.load %arg1[%c0, %c0_0] : memref<16x32xf32, #tpu.memory_space<vmem>>, vector<16x32xf32>
    %c0_1 = arith.constant 0 : index
    %c0_2 = arith.constant 0 : index
    %1 = vector.load %arg2[%c0_1, %c0_2] : memref<32x192xf32, #tpu.memory_space<vmem>>, vector<32x192xf32>
    %cst = arith.constant dense<0.000000e+00> : vector<16x192xf32>
    %2 = tpu.matmul %0, %1, %cst {dimension_numbers = #tpu.dot_dimension_numbers<[1], [0], [0], [1], [0, 0, 1, 1], [], []>} : vector<16x32xf32>, vector<32x192xf32>, vector<16x192xf32> -> vector<16x192xf32>
    %c0_3 = arith.constant 0 : index
    %c0_4 = arith.constant 0 : index
    %3 = vector.load %arg3[%c0_3, %c0_4] : memref<1x192xf32, #tpu.memory_space<vmem>>, vector<1x192xf32>
    %4 = vector.broadcast %3 : vector<1x192xf32> to vector<16x192xf32>
    %5 = arith.addf %2, %4 : vector<16x192xf32>
    %c0_5 = arith.constant 0 : index
    %c0_6 = arith.constant 0 : index
    %6 = vector.load %arg4[%c0_5, %c0_6] : memref<16x192xf32, #tpu.memory_space<vmem>>, vector<16x192xf32>
    tpu.vector_store %arg4[%c0_5, %c0_6], %5 {strides = array<i32>} : memref<16x192xf32, #tpu.memory_space<vmem>>, vector<16x192xf32>,
    return
  }
  func.func @transform_0(%arg0: i32) -> (i32, i32) {
    %c0_i32 = arith.constant 0 : i32
    %c0_i32_0 = arith.constant 0 : i32
    return %arg0, %c0_i32 : i32, i32
  }
  func.func @transform_1(%arg0: i32) -> (i32, i32) {
    %c0_i32 = arith.constant 0 : i32
    %c0_i32_0 = arith.constant 0 : i32
    %c0_i32_1 = arith.constant 0 : i32
    return %c0_i32, %c0_i32_0 : i32, i32
  }
  func.func @transform_2(%arg0: i32) -> (i32, i32) {
    %c0_i32 = arith.constant 0 : i32
    %c0_i32_0 = arith.constant 0 : i32
    %c0_i32_1 = arith.constant 0 : i32
    return %c0_i32, %c0_i32_0 : i32, i32
  }
  func.func @transform_3(%arg0: i32) -> (i32, i32) {
    %c0_i32 = arith.constant 0 : i32
    %c0_i32_0 = arith.constant 0 : i32
    return %arg0, %c0_i32 : i32, i32
  }
}

module attributes {stable_mosaic.version = 11 : i64} {
  func.func @_bigru_recurrent_kernel(%arg0: i32, %arg1: memref<4x2x192xf32, #tpu.memory_space<vmem>>, %arg2: memref<4x2x192xf32, #tpu.memory_space<vmem>>, %arg3: memref<64x192xf32, #tpu.memory_space<vmem>>, %arg4: memref<1x192xf32, #tpu.memory_space<vmem>>, %arg5: memref<4x2x32xf32, #tpu.memory_space<vmem>>, %arg6: memref<4x2x32xf32, #tpu.memory_space<vmem>>, %arg7: memref<2x2x32xf32, #tpu.memory_space<vmem>>, %arg8: memref<2x64xf32, #tpu.memory_space<vmem>>) attributes {dimension_semantics = [#tpu.dimension_semantics<arbitrary>], iteration_bounds = array<i64: 2>, scalar_prefetch = 0 : i64, scratch_operands = 1 : i64, tpu.core_type = #tpu.core_type<tc>, window_params = [{transform_indices = @transform_0, window_bounds = array<i64: 4, 2, 192>}, {transform_indices = @transform_1, window_bounds = array<i64: 4, 2, 192>}, {pipeline_mode = #tpu.pipeline_mode<synchronous>, transform_indices = @transform_2, window_bounds = array<i64: 64, 192>}, {pipeline_mode = #tpu.pipeline_mode<synchronous>, transform_indices = @transform_3, window_bounds = array<i64: 1, 192>}, {transform_indices = @transform_4, window_bounds = array<i64: 4, 2, 32>}, {transform_indices = @transform_5, window_bounds = array<i64: 4, 2, 32>}, {pipeline_mode = #tpu.pipeline_mode<synchronous>, transform_indices = @transform_6, window_bounds = array<i64: 2, 2, 32>}]} {
    %c0_i32 = arith.constant 0 : i32
    %0 = arith.cmpi eq, %arg0, %c0_i32 : i32
    %1 = arith.extui %0 : i1 to i32
    %c0_i32_0 = arith.constant 0 : i32
    %2 = arith.cmpi ne, %1, %c0_i32_0 : i32
    scf.if %2 {
      %cst_71 = arith.constant 0.000000e+00 : f32
      %219 = vector.broadcast %cst_71 : f32 to vector<2x64xf32>
      %c0_72 = arith.constant 0 : index
      %c0_73 = arith.constant 0 : index
      %220 = vector.load %arg8[%c0_72, %c0_73] : memref<2x64xf32, #tpu.memory_space<vmem>>, vector<2x64xf32>
      tpu.vector_store %arg8[%c0_72, %c0_73], %219 {strides = array<i32>} : memref<2x64xf32, #tpu.memory_space<vmem>>, vector<2x64xf32>,
    } else {
    }
    %c0 = arith.constant 0 : index
    %c0_1 = arith.constant 0 : index
    %3 = vector.load %arg3[%c0, %c0_1] : memref<64x192xf32, #tpu.memory_space<vmem>>, vector<64x192xf32>
    %c0_2 = arith.constant 0 : index
    %c0_3 = arith.constant 0 : index
    %4 = vector.load %arg4[%c0_2, %c0_3] : memref<1x192xf32, #tpu.memory_space<vmem>>, vector<1x192xf32>
    %5 = vector.shape_cast %4 : vector<1x192xf32> to vector<1x192xf32>
    %6 = vector.broadcast %5 : vector<1x192xf32> to vector<2x192xf32>
    %7 = tpu.iota {dimensions = array<i32: 1>} : vector<2x192xi32>
    %c64_i32 = arith.constant 64 : i32
    %c0_i32_4 = arith.constant 0 : i32
    %8 = arith.cmpi eq, %c64_i32, %c0_i32_4 : i32
    %c1_i32 = arith.constant 1 : i32
    %9 = arith.select %8, %c1_i32, %c64_i32 : i32
    %10 = vector.broadcast %9 : i32 to vector<2x192xi32>
    %11 = arith.remsi %7, %10 : vector<2x192xi32>
    %c0_i32_5 = arith.constant 0 : i32
    %12 = vector.broadcast %c0_i32_5 : i32 to vector<2x192xi32>
    %13 = arith.cmpi ne, %11, %12 : vector<2x192xi32>
    %c0_i32_6 = arith.constant 0 : i32
    %14 = vector.broadcast %c0_i32_6 : i32 to vector<2x192xi32>
    %15 = arith.cmpi slt, %11, %14 : vector<2x192xi32>
    %c0_i32_7 = arith.constant 0 : i32
    %16 = arith.cmpi slt, %9, %c0_i32_7 : i32
    %17 = vector.broadcast %16 : i1 to vector<2x192xi1>
    %18 = vector.broadcast %17 : vector<2x192xi1> to vector<2x192xi1>
    %19 = arith.xori %15, %18 : vector<2x192xi1>
    %20 = arith.andi %19, %13 : vector<2x192xi1>
    %21 = vector.broadcast %9 : i32 to vector<2x192xi32>
    %22 = arith.addi %11, %21 : vector<2x192xi32>
    %23 = arith.select %20, %22, %11 : vector<2x192xi1>, vector<2x192xi32>
    %c32_i32 = arith.constant 32 : i32
    %24 = vector.broadcast %c32_i32 : i32 to vector<2x192xi32>
    %25 = arith.cmpi slt, %23, %24 : vector<2x192xi32>
    %c0_8 = arith.constant 0 : index
    %c0_9 = arith.constant 0 : index
    %26 = vector.load %arg8[%c0_8, %c0_9] : memref<2x64xf32, #tpu.memory_space<vmem>>, vector<2x64xf32>
    %c0_i32_10 = arith.constant 0 : i32
    %cst = arith.constant dense<0.000000e+00> : vector<2x192xf32>
    %27 = tpu.matmul %26, %3, %cst {dimension_numbers = #tpu.dot_dimension_numbers<[1], [0], [0], [1], [0, 0, 1, 1], [], []>} : vector<2x64xf32>, vector<64x192xf32>, vector<2x192xf32> -> vector<2x192xf32>
    %28 = arith.addf %27, %6 : vector<2x192xf32>
    %29 = arith.index_cast %c0_i32_10 : i32 to index
    %c0_11 = arith.constant 0 : index
    %c0_12 = arith.constant 0 : index
    %30 = vector.load %arg1[%29, %c0_11, %c0_12] : memref<4x2x192xf32, #tpu.memory_space<vmem>>, vector<1x2x192xf32>
    %31 = vector.shape_cast %30 : vector<1x2x192xf32> to vector<2x192xf32>
    %c3_i32 = arith.constant 3 : i32
    %32 = arith.subi %c3_i32, %c0_i32_10 : i32
    %33 = arith.index_cast %32 : i32 to index
    %c0_13 = arith.constant 0 : index
    %c0_14 = arith.constant 0 : index
    %34 = vector.load %arg2[%33, %c0_13, %c0_14] : memref<4x2x192xf32, #tpu.memory_space<vmem>>, vector<1x2x192xf32>
    %35 = vector.shape_cast %34 : vector<1x2x192xf32> to vector<2x192xf32>
    %36 = arith.select %25, %31, %35 : vector<2x192xi1>, vector<2x192xf32>
    %37 = vector.extract_strided_slice %36 {offsets = [0, 0], sizes = [2, 64], strides = [1, 1]} : vector<2x192xf32> to vector<2x64xf32>
    %38 = vector.extract_strided_slice %28 {offsets = [0, 0], sizes = [2, 64], strides = [1, 1]} : vector<2x192xf32> to vector<2x64xf32>
    %39 = arith.addf %37, %38 : vector<2x64xf32>
    %40 = arith.negf %39 : vector<2x64xf32>
    %41 = math.exp %40 : vector<2x64xf32>
    %cst_15 = arith.constant 1.000000e+00 : f32
    %42 = vector.broadcast %cst_15 : f32 to vector<2x64xf32>
    %43 = arith.addf %42, %41 : vector<2x64xf32>
    %44 = arith.divf %42, %43 : vector<2x64xf32>
    %45 = vector.extract_strided_slice %36 {offsets = [0, 64], sizes = [2, 64], strides = [1, 1]} : vector<2x192xf32> to vector<2x64xf32>
    %46 = vector.extract_strided_slice %28 {offsets = [0, 64], sizes = [2, 64], strides = [1, 1]} : vector<2x192xf32> to vector<2x64xf32>
    %47 = arith.addf %45, %46 : vector<2x64xf32>
    %48 = arith.negf %47 : vector<2x64xf32>
    %49 = math.exp %48 : vector<2x64xf32>
    %cst_16 = arith.constant 1.000000e+00 : f32
    %50 = vector.broadcast %cst_16 : f32 to vector<2x64xf32>
    %51 = arith.addf %50, %49 : vector<2x64xf32>
    %52 = arith.divf %50, %51 : vector<2x64xf32>
    %53 = vector.extract_strided_slice %36 {offsets = [0, 128], sizes = [2, 64], strides = [1, 1]} : vector<2x192xf32> to vector<2x64xf32>
    %54 = vector.extract_strided_slice %28 {offsets = [0, 128], sizes = [2, 64], strides = [1, 1]} : vector<2x192xf32> to vector<2x64xf32>
    %55 = arith.mulf %44, %54 : vector<2x64xf32>
    %56 = arith.addf %53, %55 : vector<2x64xf32>
    %57 = math.tanh %56 : vector<2x64xf32>
    %cst_17 = arith.constant 1.000000e+00 : f32
    %58 = vector.broadcast %cst_17 : f32 to vector<2x64xf32>
    %59 = arith.subf %58, %52 : vector<2x64xf32>
    %60 = arith.mulf %59, %57 : vector<2x64xf32>
    %61 = arith.mulf %52, %26 : vector<2x64xf32>
    %62 = arith.addf %60, %61 : vector<2x64xf32>
    %63 = vector.extract_strided_slice %62 {offsets = [0, 0], sizes = [2, 32], strides = [1, 1]} : vector<2x64xf32> to vector<2x32xf32>
    %64 = arith.index_cast %c0_i32_10 : i32 to index
    %c0_18 = arith.constant 0 : index
    %c0_19 = arith.constant 0 : index
    %65 = vector.load %arg5[%64, %c0_18, %c0_19] : memref<4x2x32xf32, #tpu.memory_space<vmem>>, vector<1x2x32xf32>
    %66 = vector.shape_cast %65 : vector<1x2x32xf32> to vector<2x32xf32>
    %67 = vector.shape_cast %63 : vector<2x32xf32> to vector<1x2x32xf32>
    tpu.vector_store %arg5[%64, %c0_18, %c0_19], %67 {strides = array<i32>} : memref<4x2x32xf32, #tpu.memory_space<vmem>>, vector<1x2x32xf32>,
    %68 = vector.extract_strided_slice %62 {offsets = [0, 32], sizes = [2, 32], strides = [1, 1]} : vector<2x64xf32> to vector<2x32xf32>
    %c3_i32_20 = arith.constant 3 : i32
    %69 = arith.subi %c3_i32_20, %c0_i32_10 : i32
    %70 = arith.index_cast %69 : i32 to index
    %c0_21 = arith.constant 0 : index
    %c0_22 = arith.constant 0 : index
    %71 = vector.load %arg6[%70, %c0_21, %c0_22] : memref<4x2x32xf32, #tpu.memory_space<vmem>>, vector<1x2x32xf32>
    %72 = vector.shape_cast %71 : vector<1x2x32xf32> to vector<2x32xf32>
    %73 = vector.shape_cast %68 : vector<2x32xf32> to vector<1x2x32xf32>
    tpu.vector_store %arg6[%70, %c0_21, %c0_22], %73 {strides = array<i32>} : memref<4x2x32xf32, #tpu.memory_space<vmem>>, vector<1x2x32xf32>,
    %c1_i32_23 = arith.constant 1 : i32
    %cst_24 = arith.constant dense<0.000000e+00> : vector<2x192xf32>
    %74 = tpu.matmul %62, %3, %cst_24 {dimension_numbers = #tpu.dot_dimension_numbers<[1], [0], [0], [1], [0, 0, 1, 1], [], []>} : vector<2x64xf32>, vector<64x192xf32>, vector<2x192xf32> -> vector<2x192xf32>
    %75 = arith.addf %74, %6 : vector<2x192xf32>
    %76 = arith.index_cast %c1_i32_23 : i32 to index
    %c0_25 = arith.constant 0 : index
    %c0_26 = arith.constant 0 : index
    %77 = vector.load %arg1[%76, %c0_25, %c0_26] : memref<4x2x192xf32, #tpu.memory_space<vmem>>, vector<1x2x192xf32>
    %78 = vector.shape_cast %77 : vector<1x2x192xf32> to vector<2x192xf32>
    %c3_i32_27 = arith.constant 3 : i32
    %79 = arith.subi %c3_i32_27, %c1_i32_23 : i32
    %80 = arith.index_cast %79 : i32 to index
    %c0_28 = arith.constant 0 : index
    %c0_29 = arith.constant 0 : index
    %81 = vector.load %arg2[%80, %c0_28, %c0_29] : memref<4x2x192xf32, #tpu.memory_space<vmem>>, vector<1x2x192xf32>
    %82 = vector.shape_cast %81 : vector<1x2x192xf32> to vector<2x192xf32>
    %83 = arith.select %25, %78, %82 : vector<2x192xi1>, vector<2x192xf32>
    %84 = vector.extract_strided_slice %83 {offsets = [0, 0], sizes = [2, 64], strides = [1, 1]} : vector<2x192xf32> to vector<2x64xf32>
    %85 = vector.extract_strided_slice %75 {offsets = [0, 0], sizes = [2, 64], strides = [1, 1]} : vector<2x192xf32> to vector<2x64xf32>
    %86 = arith.addf %84, %85 : vector<2x64xf32>
    %87 = arith.negf %86 : vector<2x64xf32>
    %88 = math.exp %87 : vector<2x64xf32>
    %cst_30 = arith.constant 1.000000e+00 : f32
    %89 = vector.broadcast %cst_30 : f32 to vector<2x64xf32>
    %90 = arith.addf %89, %88 : vector<2x64xf32>
    %91 = arith.divf %89, %90 : vector<2x64xf32>
    %92 = vector.extract_strided_slice %83 {offsets = [0, 64], sizes = [2, 64], strides = [1, 1]} : vector<2x192xf32> to vector<2x64xf32>
    %93 = vector.extract_strided_slice %75 {offsets = [0, 64], sizes = [2, 64], strides = [1, 1]} : vector<2x192xf32> to vector<2x64xf32>
    %94 = arith.addf %92, %93 : vector<2x64xf32>
    %95 = arith.negf %94 : vector<2x64xf32>
    %96 = math.exp %95 : vector<2x64xf32>
    %cst_31 = arith.constant 1.000000e+00 : f32
    %97 = vector.broadcast %cst_31 : f32 to vector<2x64xf32>
    %98 = arith.addf %97, %96 : vector<2x64xf32>
    %99 = arith.divf %97, %98 : vector<2x64xf32>
    %100 = vector.extract_strided_slice %83 {offsets = [0, 128], sizes = [2, 64], strides = [1, 1]} : vector<2x192xf32> to vector<2x64xf32>
    %101 = vector.extract_strided_slice %75 {offsets = [0, 128], sizes = [2, 64], strides = [1, 1]} : vector<2x192xf32> to vector<2x64xf32>
    %102 = arith.mulf %91, %101 : vector<2x64xf32>
    %103 = arith.addf %100, %102 : vector<2x64xf32>
    %104 = math.tanh %103 : vector<2x64xf32>
    %cst_32 = arith.constant 1.000000e+00 : f32
    %105 = vector.broadcast %cst_32 : f32 to vector<2x64xf32>
    %106 = arith.subf %105, %99 : vector<2x64xf32>
    %107 = arith.mulf %106, %104 : vector<2x64xf32>
    %108 = arith.mulf %99, %62 : vector<2x64xf32>
    %109 = arith.addf %107, %108 : vector<2x64xf32>
    %110 = vector.extract_strided_slice %109 {offsets = [0, 0], sizes = [2, 32], strides = [1, 1]} : vector<2x64xf32> to vector<2x32xf32>
    %111 = arith.index_cast %c1_i32_23 : i32 to index
    %c0_33 = arith.constant 0 : index
    %c0_34 = arith.constant 0 : index
    %112 = vector.load %arg5[%111, %c0_33, %c0_34] : memref<4x2x32xf32, #tpu.memory_space<vmem>>, vector<1x2x32xf32>
    %113 = vector.shape_cast %112 : vector<1x2x32xf32> to vector<2x32xf32>
    %114 = vector.shape_cast %110 : vector<2x32xf32> to vector<1x2x32xf32>
    tpu.vector_store %arg5[%111, %c0_33, %c0_34], %114 {strides = array<i32>} : memref<4x2x32xf32, #tpu.memory_space<vmem>>, vector<1x2x32xf32>,
    %115 = vector.extract_strided_slice %109 {offsets = [0, 32], sizes = [2, 32], strides = [1, 1]} : vector<2x64xf32> to vector<2x32xf32>
    %c3_i32_35 = arith.constant 3 : i32
    %116 = arith.subi %c3_i32_35, %c1_i32_23 : i32
    %117 = arith.index_cast %116 : i32 to index
    %c0_36 = arith.constant 0 : index
    %c0_37 = arith.constant 0 : index
    %118 = vector.load %arg6[%117, %c0_36, %c0_37] : memref<4x2x32xf32, #tpu.memory_space<vmem>>, vector<1x2x32xf32>
    %119 = vector.shape_cast %118 : vector<1x2x32xf32> to vector<2x32xf32>
    %120 = vector.shape_cast %115 : vector<2x32xf32> to vector<1x2x32xf32>
    tpu.vector_store %arg6[%117, %c0_36, %c0_37], %120 {strides = array<i32>} : memref<4x2x32xf32, #tpu.memory_space<vmem>>, vector<1x2x32xf32>,
    %c2_i32 = arith.constant 2 : i32
    %cst_38 = arith.constant dense<0.000000e+00> : vector<2x192xf32>
    %121 = tpu.matmul %109, %3, %cst_38 {dimension_numbers = #tpu.dot_dimension_numbers<[1], [0], [0], [1], [0, 0, 1, 1], [], []>} : vector<2x64xf32>, vector<64x192xf32>, vector<2x192xf32> -> vector<2x192xf32>
    %122 = arith.addf %121, %6 : vector<2x192xf32>
    %123 = arith.index_cast %c2_i32 : i32 to index
    %c0_39 = arith.constant 0 : index
    %c0_40 = arith.constant 0 : index
    %124 = vector.load %arg1[%123, %c0_39, %c0_40] : memref<4x2x192xf32, #tpu.memory_space<vmem>>, vector<1x2x192xf32>
    %125 = vector.shape_cast %124 : vector<1x2x192xf32> to vector<2x192xf32>
    %c3_i32_41 = arith.constant 3 : i32
    %126 = arith.subi %c3_i32_41, %c2_i32 : i32
    %127 = arith.index_cast %126 : i32 to index
    %c0_42 = arith.constant 0 : index
    %c0_43 = arith.constant 0 : index
    %128 = vector.load %arg2[%127, %c0_42, %c0_43] : memref<4x2x192xf32, #tpu.memory_space<vmem>>, vector<1x2x192xf32>
    %129 = vector.shape_cast %128 : vector<1x2x192xf32> to vector<2x192xf32>
    %130 = arith.select %25, %125, %129 : vector<2x192xi1>, vector<2x192xf32>
    %131 = vector.extract_strided_slice %130 {offsets = [0, 0], sizes = [2, 64], strides = [1, 1]} : vector<2x192xf32> to vector<2x64xf32>
    %132 = vector.extract_strided_slice %122 {offsets = [0, 0], sizes = [2, 64], strides = [1, 1]} : vector<2x192xf32> to vector<2x64xf32>
    %133 = arith.addf %131, %132 : vector<2x64xf32>
    %134 = arith.negf %133 : vector<2x64xf32>
    %135 = math.exp %134 : vector<2x64xf32>
    %cst_44 = arith.constant 1.000000e+00 : f32
    %136 = vector.broadcast %cst_44 : f32 to vector<2x64xf32>
    %137 = arith.addf %136, %135 : vector<2x64xf32>
    %138 = arith.divf %136, %137 : vector<2x64xf32>
    %139 = vector.extract_strided_slice %130 {offsets = [0, 64], sizes = [2, 64], strides = [1, 1]} : vector<2x192xf32> to vector<2x64xf32>
    %140 = vector.extract_strided_slice %122 {offsets = [0, 64], sizes = [2, 64], strides = [1, 1]} : vector<2x192xf32> to vector<2x64xf32>
    %141 = arith.addf %139, %140 : vector<2x64xf32>
    %142 = arith.negf %141 : vector<2x64xf32>
    %143 = math.exp %142 : vector<2x64xf32>
    %cst_45 = arith.constant 1.000000e+00 : f32
    %144 = vector.broadcast %cst_45 : f32 to vector<2x64xf32>
    %145 = arith.addf %144, %143 : vector<2x64xf32>
    %146 = arith.divf %144, %145 : vector<2x64xf32>
    %147 = vector.extract_strided_slice %130 {offsets = [0, 128], sizes = [2, 64], strides = [1, 1]} : vector<2x192xf32> to vector<2x64xf32>
    %148 = vector.extract_strided_slice %122 {offsets = [0, 128], sizes = [2, 64], strides = [1, 1]} : vector<2x192xf32> to vector<2x64xf32>
    %149 = arith.mulf %138, %148 : vector<2x64xf32>
    %150 = arith.addf %147, %149 : vector<2x64xf32>
    %151 = math.tanh %150 : vector<2x64xf32>
    %cst_46 = arith.constant 1.000000e+00 : f32
    %152 = vector.broadcast %cst_46 : f32 to vector<2x64xf32>
    %153 = arith.subf %152, %146 : vector<2x64xf32>
    %154 = arith.mulf %153, %151 : vector<2x64xf32>
    %155 = arith.mulf %146, %109 : vector<2x64xf32>
    %156 = arith.addf %154, %155 : vector<2x64xf32>
    %157 = vector.extract_strided_slice %156 {offsets = [0, 0], sizes = [2, 32], strides = [1, 1]} : vector<2x64xf32> to vector<2x32xf32>
    %158 = arith.index_cast %c2_i32 : i32 to index
    %c0_47 = arith.constant 0 : index
    %c0_48 = arith.constant 0 : index
    %159 = vector.load %arg5[%158, %c0_47, %c0_48] : memref<4x2x32xf32, #tpu.memory_space<vmem>>, vector<1x2x32xf32>
    %160 = vector.shape_cast %159 : vector<1x2x32xf32> to vector<2x32xf32>
    %161 = vector.shape_cast %157 : vector<2x32xf32> to vector<1x2x32xf32>
    tpu.vector_store %arg5[%158, %c0_47, %c0_48], %161 {strides = array<i32>} : memref<4x2x32xf32, #tpu.memory_space<vmem>>, vector<1x2x32xf32>,
    %162 = vector.extract_strided_slice %156 {offsets = [0, 32], sizes = [2, 32], strides = [1, 1]} : vector<2x64xf32> to vector<2x32xf32>
    %c3_i32_49 = arith.constant 3 : i32
    %163 = arith.subi %c3_i32_49, %c2_i32 : i32
    %164 = arith.index_cast %163 : i32 to index
    %c0_50 = arith.constant 0 : index
    %c0_51 = arith.constant 0 : index
    %165 = vector.load %arg6[%164, %c0_50, %c0_51] : memref<4x2x32xf32, #tpu.memory_space<vmem>>, vector<1x2x32xf32>
    %166 = vector.shape_cast %165 : vector<1x2x32xf32> to vector<2x32xf32>
    %167 = vector.shape_cast %162 : vector<2x32xf32> to vector<1x2x32xf32>
    tpu.vector_store %arg6[%164, %c0_50, %c0_51], %167 {strides = array<i32>} : memref<4x2x32xf32, #tpu.memory_space<vmem>>, vector<1x2x32xf32>,
    %c3_i32_52 = arith.constant 3 : i32
    %cst_53 = arith.constant dense<0.000000e+00> : vector<2x192xf32>
    %168 = tpu.matmul %156, %3, %cst_53 {dimension_numbers = #tpu.dot_dimension_numbers<[1], [0], [0], [1], [0, 0, 1, 1], [], []>} : vector<2x64xf32>, vector<64x192xf32>, vector<2x192xf32> -> vector<2x192xf32>
    %169 = arith.addf %168, %6 : vector<2x192xf32>
    %170 = arith.index_cast %c3_i32_52 : i32 to index
    %c0_54 = arith.constant 0 : index
    %c0_55 = arith.constant 0 : index
    %171 = vector.load %arg1[%170, %c0_54, %c0_55] : memref<4x2x192xf32, #tpu.memory_space<vmem>>, vector<1x2x192xf32>
    %172 = vector.shape_cast %171 : vector<1x2x192xf32> to vector<2x192xf32>
    %c3_i32_56 = arith.constant 3 : i32
    %173 = arith.subi %c3_i32_56, %c3_i32_52 : i32
    %174 = arith.index_cast %173 : i32 to index
    %c0_57 = arith.constant 0 : index
    %c0_58 = arith.constant 0 : index
    %175 = vector.load %arg2[%174, %c0_57, %c0_58] : memref<4x2x192xf32, #tpu.memory_space<vmem>>, vector<1x2x192xf32>
    %176 = vector.shape_cast %175 : vector<1x2x192xf32> to vector<2x192xf32>
    %177 = arith.select %25, %172, %176 : vector<2x192xi1>, vector<2x192xf32>
    %178 = vector.extract_strided_slice %177 {offsets = [0, 0], sizes = [2, 64], strides = [1, 1]} : vector<2x192xf32> to vector<2x64xf32>
    %179 = vector.extract_strided_slice %169 {offsets = [0, 0], sizes = [2, 64], strides = [1, 1]} : vector<2x192xf32> to vector<2x64xf32>
    %180 = arith.addf %178, %179 : vector<2x64xf32>
    %181 = arith.negf %180 : vector<2x64xf32>
    %182 = math.exp %181 : vector<2x64xf32>
    %cst_59 = arith.constant 1.000000e+00 : f32
    %183 = vector.broadcast %cst_59 : f32 to vector<2x64xf32>
    %184 = arith.addf %183, %182 : vector<2x64xf32>
    %185 = arith.divf %183, %184 : vector<2x64xf32>
    %186 = vector.extract_strided_slice %177 {offsets = [0, 64], sizes = [2, 64], strides = [1, 1]} : vector<2x192xf32> to vector<2x64xf32>
    %187 = vector.extract_strided_slice %169 {offsets = [0, 64], sizes = [2, 64], strides = [1, 1]} : vector<2x192xf32> to vector<2x64xf32>
    %188 = arith.addf %186, %187 : vector<2x64xf32>
    %189 = arith.negf %188 : vector<2x64xf32>
    %190 = math.exp %189 : vector<2x64xf32>
    %cst_60 = arith.constant 1.000000e+00 : f32
    %191 = vector.broadcast %cst_60 : f32 to vector<2x64xf32>
    %192 = arith.addf %191, %190 : vector<2x64xf32>
    %193 = arith.divf %191, %192 : vector<2x64xf32>
    %194 = vector.extract_strided_slice %177 {offsets = [0, 128], sizes = [2, 64], strides = [1, 1]} : vector<2x192xf32> to vector<2x64xf32>
    %195 = vector.extract_strided_slice %169 {offsets = [0, 128], sizes = [2, 64], strides = [1, 1]} : vector<2x192xf32> to vector<2x64xf32>
    %196 = arith.mulf %185, %195 : vector<2x64xf32>
    %197 = arith.addf %194, %196 : vector<2x64xf32>
    %198 = math.tanh %197 : vector<2x64xf32>
    %cst_61 = arith.constant 1.000000e+00 : f32
    %199 = vector.broadcast %cst_61 : f32 to vector<2x64xf32>
    %200 = arith.subf %199, %193 : vector<2x64xf32>
    %201 = arith.mulf %200, %198 : vector<2x64xf32>
    %202 = arith.mulf %193, %156 : vector<2x64xf32>
    %203 = arith.addf %201, %202 : vector<2x64xf32>
    %204 = vector.extract_strided_slice %203 {offsets = [0, 0], sizes = [2, 32], strides = [1, 1]} : vector<2x64xf32> to vector<2x32xf32>
    %205 = arith.index_cast %c3_i32_52 : i32 to index
    %c0_62 = arith.constant 0 : index
    %c0_63 = arith.constant 0 : index
    %206 = vector.load %arg5[%205, %c0_62, %c0_63] : memref<4x2x32xf32, #tpu.memory_space<vmem>>, vector<1x2x32xf32>
    %207 = vector.shape_cast %206 : vector<1x2x32xf32> to vector<2x32xf32>
    %208 = vector.shape_cast %204 : vector<2x32xf32> to vector<1x2x32xf32>
    tpu.vector_store %arg5[%205, %c0_62, %c0_63], %208 {strides = array<i32>} : memref<4x2x32xf32, #tpu.memory_space<vmem>>, vector<1x2x32xf32>,
    %209 = vector.extract_strided_slice %203 {offsets = [0, 32], sizes = [2, 32], strides = [1, 1]} : vector<2x64xf32> to vector<2x32xf32>
    %c3_i32_64 = arith.constant 3 : i32
    %210 = arith.subi %c3_i32_64, %c3_i32_52 : i32
    %211 = arith.index_cast %210 : i32 to index
    %c0_65 = arith.constant 0 : index
    %c0_66 = arith.constant 0 : index
    %212 = vector.load %arg6[%211, %c0_65, %c0_66] : memref<4x2x32xf32, #tpu.memory_space<vmem>>, vector<1x2x32xf32>
    %213 = vector.shape_cast %212 : vector<1x2x32xf32> to vector<2x32xf32>
    %214 = vector.shape_cast %209 : vector<2x32xf32> to vector<1x2x32xf32>
    tpu.vector_store %arg6[%211, %c0_65, %c0_66], %214 {strides = array<i32>} : memref<4x2x32xf32, #tpu.memory_space<vmem>>, vector<1x2x32xf32>,
    %c4_i32 = arith.constant 4 : i32
    %c0_67 = arith.constant 0 : index
    %c0_68 = arith.constant 0 : index
    %215 = vector.load %arg8[%c0_67, %c0_68] : memref<2x64xf32, #tpu.memory_space<vmem>>, vector<2x64xf32>
    tpu.vector_store %arg8[%c0_67, %c0_68], %203 {strides = array<i32>} : memref<2x64xf32, #tpu.memory_space<vmem>>, vector<2x64xf32>,
    %c1_i32_69 = arith.constant 1 : i32
    %216 = arith.cmpi eq, %arg0, %c1_i32_69 : i32
    %217 = arith.extui %216 : i1 to i32
    %c0_i32_70 = arith.constant 0 : i32
    %218 = arith.cmpi ne, %217, %c0_i32_70 : i32
    scf.if %218 {
      %219 = vector.extract_strided_slice %203 {offsets = [0, 0], sizes = [2, 32], strides = [1, 1]} : vector<2x64xf32> to vector<2x32xf32>
      %c0_71 = arith.constant 0 : index
      %c0_72 = arith.constant 0 : index
      %c0_73 = arith.constant 0 : index
      %220 = vector.load %arg7[%c0_71, %c0_72, %c0_73] : memref<2x2x32xf32, #tpu.memory_space<vmem>>, vector<1x2x32xf32>
      %221 = vector.shape_cast %220 : vector<1x2x32xf32> to vector<2x32xf32>
      %222 = vector.shape_cast %219 : vector<2x32xf32> to vector<1x2x32xf32>
      tpu.vector_store %arg7[%c0_71, %c0_72, %c0_73], %222 {strides = array<i32>} : memref<2x2x32xf32, #tpu.memory_space<vmem>>, vector<1x2x32xf32>,
      %223 = vector.extract_strided_slice %203 {offsets = [0, 32], sizes = [2, 32], strides = [1, 1]} : vector<2x64xf32> to vector<2x32xf32>
      %c1 = arith.constant 1 : index
      %c0_74 = arith.constant 0 : index
      %c0_75 = arith.constant 0 : index
      %224 = vector.load %arg7[%c1, %c0_74, %c0_75] : memref<2x2x32xf32, #tpu.memory_space<vmem>>, vector<1x2x32xf32>
      %225 = vector.shape_cast %224 : vector<1x2x32xf32> to vector<2x32xf32>
      %226 = vector.shape_cast %223 : vector<2x32xf32> to vector<1x2x32xf32>
      tpu.vector_store %arg7[%c1, %c0_74, %c0_75], %226 {strides = array<i32>} : memref<2x2x32xf32, #tpu.memory_space<vmem>>, vector<1x2x32xf32>,
    } else {
    }
    return
  }
  func.func @transform_0(%arg0: i32) -> (i32, i32, i32) {
    %c0_i32 = arith.constant 0 : i32
    %c0_i32_0 = arith.constant 0 : i32
    %c0_i32_1 = arith.constant 0 : i32
    return %arg0, %c0_i32, %c0_i32_0 : i32, i32, i32
  }
  func.func @transform_1(%arg0: i32) -> (i32, i32, i32) {
    %c1_i32 = arith.constant 1 : i32
    %0 = arith.subi %c1_i32, %arg0 : i32
    %c0_i32 = arith.constant 0 : i32
    %c0_i32_0 = arith.constant 0 : i32
    %c0_i32_1 = arith.constant 0 : i32
    return %0, %c0_i32, %c0_i32_0 : i32, i32, i32
  }
  func.func @transform_2(%arg0: i32) -> (i32, i32) {
    %c0_i32 = arith.constant 0 : i32
    %c0_i32_0 = arith.constant 0 : i32
    %c0_i32_1 = arith.constant 0 : i32
    return %c0_i32, %c0_i32_0 : i32, i32
  }
  func.func @transform_3(%arg0: i32) -> (i32, i32) {
    %c0_i32 = arith.constant 0 : i32
    %c0_i32_0 = arith.constant 0 : i32
    %c0_i32_1 = arith.constant 0 : i32
    return %c0_i32, %c0_i32_0 : i32, i32
  }
  func.func @transform_4(%arg0: i32) -> (i32, i32, i32) {
    %c0_i32 = arith.constant 0 : i32
    %c0_i32_0 = arith.constant 0 : i32
    %c0_i32_1 = arith.constant 0 : i32
    return %arg0, %c0_i32, %c0_i32_0 : i32, i32, i32
  }
  func.func @transform_5(%arg0: i32) -> (i32, i32, i32) {
    %c1_i32 = arith.constant 1 : i32
    %0 = arith.subi %c1_i32, %arg0 : i32
    %c0_i32 = arith.constant 0 : i32
    %c0_i32_0 = arith.constant 0 : i32
    %c0_i32_1 = arith.constant 0 : i32
    return %0, %c0_i32, %c0_i32_0 : i32, i32, i32
  }
  func.func @transform_6(%arg0: i32) -> (i32, i32, i32) {
    %c0_i32 = arith.constant 0 : i32
    %c0_i32_0 = arith.constant 0 : i32
    %c0_i32_1 = arith.constant 0 : i32
    %c0_i32_2 = arith.constant 0 : i32
    return %c0_i32, %c0_i32_0, %c0_i32_1 : i32, i32, i32
  }
}

</mosaic_0001>

<bundles_post_ra>
// kernel: encoder_forward.2
= control target key start
LH: loop header
LB: loop body
LE: loop exit
PB: predicated region body
PF: predicated region fallthrough
CT: control target
= control target key end

     0   :  { %vm30_vm0 = vcmask 261120   ;;  %vm84_vm1 = vcmask 523264   ;;  %s169_s1 = inlined_call_operand.vmem [shape: f32[32,192], index: 1, kind: input, shape index: {}]   ;;  %s170_s0 = inlined_call_operand.vmem [shape: f32[16,32], index: 0, kind: input, shape index: {}]   ;;  %s171_s2 = inlined_call_operand.vmem [shape: f32[1,192], index: 2, kind: input, shape index: {}]   ;;  %s172_s3 = inlined_call_operand.vmem [shape: f32[16,192], index: 3, kind: output, shape index: {}]  }
   0x1   :  { %v22_v0 = vld [vmem:[%s169_s1 + $0x30] sm:$0xff]  ;;  %v23_v1 = vld [vmem:[%s169_s1 + $0x38] sm:$0xff]  ;;  %v20_v2 = vld [vmem:[%s169_s1 + $0x20] sm:$0xff] }
   0x2   :  { %96 = vmatpush.msra.mxu2 %v22_v0  ;;  %100 = vmatpush.msra.mxu3 %v23_v1  ;;  %v21_v3 = vld [vmem:[%s169_s1 + $0x28] sm:$0xff]  ;;  %v18_v4 = vld [vmem:[%s169_s1 + $0x10] sm:$0xff]  ;;  %v19_v5 = vld [vmem:[%s169_s1 + $0x18] sm:$0xff] }
   0x3   :  { %49 = vmatpush.msra.mxu0 %v22_v0  ;;  %72 = vmatpush.msra.mxu1 %v23_v1  ;;  %v16_v6 = vld [vmem:[%s169_s1] sm:$0xff]  ;;  %v17_v7 = vld [vmem:[%s169_s1 + $0x8] sm:$0xff] }
   0x4   :  { %97 = vmatpush.msra.mxu2 %v20_v2  ;;  %101 = vmatpush.msra.mxu3 %v21_v3  ;;  %v15_v8 = vld [vmem:[%s170_s0 + $0x8] sm:$0xff]  ;;  %v14_v9 = vld [vmem:[%s170_s0] sm:$0xff] }
   0x5   :  { %50 = vmatpush.msra.mxu0 %v20_v2  ;;  %73 = vmatpush.msra.mxu1 %v21_v3  ;;  %v24_v10 = vld [vmem:[%s171_s2] sm:$0x3] }
   0x6   :  { %98 = vmatpush.msra.mxu2 %v18_v4  ;;  %102 = vmatpush.msra.mxu3 %v19_v5  ;;  %v26_v11 = vperm.slane %v24_v10, 0  ;;  %v27_v12 = vperm.slane %v24_v10, 1 }
   0x7   :  { %51 = vmatpush.msra.mxu0 %v18_v4  ;;  %74 = vmatpush.msra.mxu1 %v19_v5 }
   0x8   :  { %99 = vmatpush.msra.mxu2 %v16_v6  ;;  %103 = vmatpush.msra.mxu3 %v17_v7 }
   0x9   :  { %93 = vmatmul.msk.f32.vlgmr.msra.gmra.mxu2 %vm30_vm0, %v15_v8  ;;  %95 = vmatmul.msk.f32.vlgmr.msra.gmra.mxu3 %vm30_vm0, %v15_v8 }
   0xa   :  { %52 = vmatpush.msra.mxu0 %v16_v6  ;;  %75 = vmatpush.msra.mxu1 %v17_v7 }
   0xb   :  { %92 = vmatmul.msk.f32.vlgmr.msra.gmra.mxu0 %vm30_vm0, %v14_v9  ;;  %94 = vmatmul.msk.f32.vlgmr.msra.gmra.mxu1 %vm30_vm0, %v14_v9 }
  0x88   :  { %v54_v13 = vpop.f32.mrf.mxu0  ;;  %v77_v14 = vpop.f32.mrf.mxu1 }
  0x89   :  { %v55_v15 = vadd.f32 %v54_v13, %v26_v11  ;;  %v78_v16 = vadd.f32 %v77_v14, %v27_v12 }
  0x8b   :  { %83 = vst [vmem:[%s172_s3] sm:$0xff] %v55_v15 }
  0x8c   :  { %v57_v17 = vpop.f32.mrf.mxu2  ;;  %85 = vst.msk [vmem:[%s172_s3 + $0x8] sm:$0xff] %vm84_vm1, %v78_v16  ;;  %v80_v18 = vpop.f32.mrf.mxu3 }
  0x8d   :  { %v58_v19 = vadd.f32 %v57_v17, %v26_v11  ;;  %v81_v20 = vadd.f32 %v80_v18, %v27_v12 }
  0x8f   :  { %86 = vst [vmem:[%s172_s3 + $0x10] sm:$0xff] %v58_v19 }
  0x90   :  { %87 = vst.msk [vmem:[%s172_s3 + $0x18] sm:$0xff] %vm84_vm1, %v81_v20 }

// kernel: encoder_forward.3
= control target key start
LH: loop header
LB: loop body
LE: loop exit
PB: predicated region body
PF: predicated region fallthrough
CT: control target
= control target key end

     0   :  { %12 = vsyncpa [#allocation4], 0  ;;  %s1087_s21 = smov 0   ;;  %s1274_s0 = inlined_call_operand.vmem [shape: f32[8,2,192], index: 0, kind: input, shape index: {}, may-alias: {0,1}]   ;;  %s1275_s1 = inlined_call_operand.vmem [shape: f32[8,2,192], index: 1, kind: input, shape index: {}, may-alias: {0,1}]   ;;  %s1276_s2 = inlined_call_operand.vmem [shape: f32[64,192], index: 2, kind: input, shape index: {}]   ;;  %s1277_s3 = inlined_call_operand.vmem [shape: f32[1,192], index: 3, kind: input, shape index: {}]   ;;  %s1278_s4 = inlined_call_operand.vmem [shape: f32[8,2,32], index: 4, kind: output, shape index: {0}]   ;;  %s1279_s5 = inlined_call_operand.vmem [shape: f32[8,2,32], index: 5, kind: output, shape index: {1}]   ;;  %s1280_s6 = inlined_call_operand.hbm [shape: f32[2,2,32], index: 6, kind: output, shape index: {2}]  }
   0x1 LB: > { %s1093_s22 = sadd.s32 4294967295, %s1045_s21   ;;  %p921_p0 = scmp.ge.s32.totalorder %s1045_s21, 1  ;;  %s1045_s21 = sphi %s1087_s21, %s18_s21  }
   0x2   : > { %p233_p1 = scmp.lt.s32.totalorder %s1045_s21, 3 }
   0x4   : > { %p234_p2 = pnand %p921_p0, %p233_p1 }
   0x5   : > { %s922_s23 = sshll.u32 (!%p234_p2), %s1093_s22, 2  ;;  %s284_s24 = ssub.s32 (!%p234_p2), 1, %s1093_s22 }
   0x6   : > { %237 = sbr.rel (%p234_p2) target bundleno = 1631 (0x65f), region = 36  ;;  %p278_p3 = scmp.lt.s32.totalorder (!%p234_p2), %s922_s23, 7 }
   0x7   : > { %s925_s25 = sshll.u32 (!%p234_p2), %s284_s24, 2  ;;  %p932_p5 = scmp.ne.s32.totalorder (!%p234_p2), %s1093_s22, 0 }
   0x8   : > { %p286_p4 = scmp.lt.s32.totalorder (!%p234_p2), %s925_s25, 7 }
   0xb   : > { %s1286_s23 = smov (!%p278_p3, %s922_s23), 7  ;;  %s1288_s25 = smov (!%p286_p4, %s925_s25), 7 }
   0xc   : > { %s962_s26 = sshll.u32 %s1286_s23, 2  ;;  %s929_s27 = sshll.u32 %s1286_s23, 1 }
   0xd   : > { %s1102_s30 = scalar_lea.vmem %s1274_s0, %s962_s26  ;;  %s963_s7 = sshll.u32 %s1288_s25, 2 }
   0xe   : > { %s1107_s10 = scalar_lea.vmem %s1275_s1, %s963_s7  ;;  %s1112_s13 = scalar_lea.vmem %s1278_s4, %s929_s27 }
   0xf   : > { %s931_s14 = sshll.u32 %s1288_s25, 1  ;;  %310 = sbr.rel (%p932_p5) target bundleno = 22 (0x16), region = 40 }
  0x10   : > { %s1117_s17 = scalar_lea.vmem %s1279_s5, %s931_s14 }
  0x14   : > { %vm311_vm0 = vcmask 517120   ;;  %v1047_v0 = vmov 0.0  }
  0x15   : > { %312 = vst.msk [vmem:[#allocation2] sm:$0x3] %vm311_vm0, %v1047_v0 }
  0x16 PF: > { %v327_v1 = vld [vmem:[%s1276_s2 + $0x70] sm:$0xff]  ;;  %v325_v2 = vld [vmem:[%s1276_s2 + $0x60] sm:$0xff]  ;;  %v328_v4 = vld [vmem:[%s1276_s2 + $0x78] sm:$0xff]  ;;  %vm365_vm1 = vcmask 523264   ;;  %v335_v22 = vlaneseq  ;;  %s1048_s15 = smov 64   ;;  %vm464_vm8 = vcmask 254976  }
  0x17   : > { %377 = vmatpush.msra.mxu0 %v327_v1  ;;  %481 = vmatpush.msra.mxu2 %v327_v1  ;;  %v323_v3 = vld [vmem:[%s1276_s2 + $0x50] sm:$0xff]  ;;  %v326_v5 = vld [vmem:[%s1276_s2 + $0x68] sm:$0xff]  ;;  %v321_v6 = vld [vmem:[%s1276_s2 + $0x40] sm:$0xff]  ;;  %p957_p6 = scmp.ne.s32.totalorder %s1093_s22, 1 }
  0x18   : > { %397 = vmatpush.msra.mxu1 %v328_v4  ;;  %501 = vmatpush.msra.mxu3 %v328_v4  ;;  %v324_v7 = vld [vmem:[%s1276_s2 + $0x58] sm:$0xff]  ;;  %v319_v8 = vld [vmem:[%s1276_s2 + $0x30] sm:$0xff]  ;;  %v322_v9 = vld [vmem:[%s1276_s2 + $0x48] sm:$0xff]  ;;  %v336_v23 = vand.u32 127, %v335_v22 }
  0x19   : > { %378 = vmatpush.msra.mxu0 %v325_v2  ;;  %482 = vmatpush.msra.mxu2 %v325_v2  ;;  %v317_v10 = vld [vmem:[%s1276_s2 + $0x20] sm:$0xff]  ;;  %v320_v11 = vld [vmem:[%s1276_s2 + $0x38] sm:$0xff]  ;;  %v315_v12 = vld [vmem:[%s1276_s2 + $0x10] sm:$0xff] }
  0x1a   : > { %398 = vmatpush.msra.mxu1 %v326_v5  ;;  %502 = vmatpush.msra.mxu3 %v326_v5  ;;  %v318_v13 = vld [vmem:[%s1276_s2 + $0x28] sm:$0xff]  ;;  %v313_v14 = vld [vmem:[%s1276_s2] sm:$0xff]  ;;  %v316_v16 = vld [vmem:[%s1276_s2 + $0x18] sm:$0xff]  ;;  %v342_v24 = vand.u32 63, %v336_v23  ;;  %v337_v38 = vadd.s32 128, %v336_v23 }
  0x1b   : > { %379 = vmatpush.msra.mxu0 %v323_v3  ;;  %483 = vmatpush.msra.mxu2 %v323_v3  ;;  %v314_v17 = vld [vmem:[%s1276_s2 + $0x8] sm:$0xff]  ;;  %v409_v18 = vld [vmem:[%s1102_s30] sm:$0xf]  ;;  %v940_v35 = vld [vmem:[%s1102_s30 + $0x4] sm:$0xf] }
  0x1c   : > { %399 = vmatpush.msra.mxu1 %v324_v7  ;;  %503 = vmatpush.msra.mxu3 %v324_v7  ;;  %v1162_v15 = vld [vmem:[#allocation2] sm:$0x3]  ;;  %413 = vst [vmem:[#allocation1] ss:$4 sm:$0xff] %v409_v18  ;;  %v935_v19 = vld [vmem:[%s1107_s10 + $0xc] sm:$0xf] }
  0x1d   : > { %380 = vmatpush.msra.mxu0 %v321_v6  ;;  %484 = vmatpush.msra.mxu2 %v321_v6  ;;  %v329_v25 = vld [vmem:[%s1277_s3] sm:$0x3]  ;;  %vm1181_vm2 = vcmp.lt.s32.totalorder %v342_v24, 32  ;;  %v349_v42 = vand.u32 63, %v337_v38 }
  0x1e   : > { %400 = vmatpush.msra.mxu1 %v322_v9  ;;  %504 = vmatpush.msra.mxu3 %v322_v9  ;;  %v1179_v26 = vperm.slane %v329_v25, 0  ;;  %v1189_v41 = vperm.slane %v329_v25, 1 }
  0x1f   : > { %381 = vmatpush.msra.mxu0 %v319_v8  ;;  %485 = vmatpush.msra.mxu2 %v319_v8  ;;  %vm1191_vm4 = vcmp.lt.s32.totalorder %v349_v42, 32 }
  0x20   : > { %401 = vmatpush.msra.mxu1 %v320_v11  ;;  %505 = vmatpush.msra.mxu3 %v320_v11 }
  0x21   : > { %382 = vmatpush.msra.mxu0 %v317_v10  ;;  %486 = vmatpush.msra.mxu2 %v317_v10 }
  0x22   : > { %402 = vmatpush.msra.mxu1 %v318_v13  ;;  %506 = vmatpush.msra.mxu3 %v318_v13 }
  0x23   : > { %383 = vmatpush.msra.mxu0 %v315_v12  ;;  %487 = vmatpush.msra.mxu2 %v315_v12  ;;  %v414_v20 = vld.sshfl [vmem:[#allocation1] sm:$0xff pattern:$0x73625140]  ;;  %v415_v21 = vld.sshfl [vmem:[#allocation1 + $0x8] sm:$0xff pattern:$0x73625140] }
  0x24   : > { %403 = vmatpush.msra.mxu1 %v316_v16  ;;  %507 = vmatpush.msra.mxu3 %v316_v16  ;;  %419 = vst [vmem:[#allocation1] ss:$4 sm:$0xff] %v935_v19 }
  0x25   : > { %384 = vmatpush.msra.mxu0 %v313_v14  ;;  %488 = vmatpush.msra.mxu2 %v313_v14 }
  0x26   : > { %933 = vmatmul.msk.f32.vlgmr.msra.gmra.mxu0 %vm365_vm1, %v1162_v15  ;;  %404 = vmatpush.msra.mxu1 %v314_v17 }
  0x27   : > { %583 = vmatpush.msrb.mxu0 %v327_v1  ;;  %685 = vmatpush.msrb.mxu2 %v327_v1  ;;  %v941_v1 = vld [vmem:[%s1107_s10 + $0x8] sm:$0xf] }
  0x28   : > { %934 = vmatmul.msk.f32.vlgmr.msra.gmra.mxu1 %vm365_vm1, %v1162_v15  ;;  %508 = vmatpush.msra.mxu3 %v314_v17 }
  0x29   : > { %603 = vmatpush.msrb.mxu1 %v328_v4  ;;  %584 = vmatpush.msrb.mxu0 %v325_v2 }
  0x2a   : > { %705 = vmatpush.msrb.mxu3 %v328_v4  ;;  %686 = vmatpush.msrb.mxu2 %v325_v2 }
  0x2b   : > { %604 = vmatpush.msrb.mxu1 %v326_v5  ;;  %585 = vmatpush.msrb.mxu0 %v323_v3  ;;  %v420_v28 = vld.sshfl [vmem:[#allocation1] sm:$0xff pattern:$0x73625140]  ;;  %v421_v33 = vld.sshfl [vmem:[#allocation1 + $0x8] sm:$0xff pattern:$0x73625140] }
  0x2c   : > { %706 = vmatpush.msrb.mxu3 %v326_v5  ;;  %687 = vmatpush.msrb.mxu2 %v323_v3  ;;  %v424_v30 = vsel %vm1181_vm2, %v414_v20, %v420_v28  ;;  %518 = vst [vmem:[#allocation1] ss:$4 sm:$0xff] %v940_v35  ;;  %v425_v53 = vsel %vm1191_vm4, %v415_v21, %v421_v33 }
  0x2d   : > { %605 = vmatpush.msrb.mxu1 %v324_v7  ;;  %586 = vmatpush.msrb.mxu0 %v321_v6 }
  0x2e   : > { %707 = vmatpush.msrb.mxu3 %v324_v7  ;;  %688 = vmatpush.msrb.mxu2 %v321_v6 }
  0x2f   : > { %606 = vmatpush.msrb.mxu1 %v322_v9  ;;  %587 = vmatpush.msrb.mxu0 %v319_v8 }
  0x30   : > { %708 = vmatpush.msrb.mxu3 %v322_v9  ;;  %689 = vmatpush.msrb.mxu2 %v319_v8 }
  0x31   : > { %607 = vmatpush.msrb.mxu1 %v320_v11  ;;  %588 = vmatpush.msrb.mxu0 %v317_v10 }
  0x32   : > { %709 = vmatpush.msrb.mxu3 %v320_v11  ;;  %690 = vmatpush.msrb.mxu2 %v317_v10  ;;  %v947_v11 = vld [vmem:[%s1102_s30 + $0x8] sm:$0xf] }
  0x33   : > { %608 = vmatpush.msrb.mxu1 %v318_v13  ;;  %589 = vmatpush.msrb.mxu0 %v315_v12  ;;  %v519_v2 = vld.sshfl [vmem:[#allocation1] sm:$0xff pattern:$0x73625140]  ;;  %v520_v3 = vld.sshfl [vmem:[#allocation1 + $0x8] sm:$0xff pattern:$0x73625140] }
  0x34   : > { %710 = vmatpush.msrb.mxu3 %v318_v13  ;;  %691 = vmatpush.msrb.mxu2 %v315_v12  ;;  %524 = vst [vmem:[#allocation1] ss:$4 sm:$0xff] %v941_v1 }
  0x35   : > { %609 = vmatpush.msrb.mxu1 %v316_v16  ;;  %590 = vmatpush.msrb.mxu0 %v313_v14 }
  0x36   : > { %711 = vmatpush.msrb.mxu3 %v316_v16  ;;  %692 = vmatpush.msrb.mxu2 %v313_v14 }
  0x37   : > { %610 = vmatpush.msrb.mxu1 %v314_v17 }
  0x38   : > { %712 = vmatpush.msrb.mxu3 %v314_v17 }
  0x3b   : > { %v525_v4 = vld.sshfl [vmem:[#allocation1] sm:$0xff pattern:$0x73625140]  ;;  %v526_v9 = vld.sshfl [vmem:[#allocation1 + $0x8] sm:$0xff pattern:$0x73625140] }
  0x3c   : > { %v529_v6 = vsel %vm1181_vm2, %v519_v2, %v525_v4  ;;  %620 = vst [vmem:[#allocation1] ss:$4 sm:$0xff] %v947_v11  ;;  %v530_v25 = vsel %vm1191_vm4, %v520_v3, %v526_v9 }
  0x43   : > { %v622_v38 = vld.sshfl [vmem:[#allocation1 + $0x8] sm:$0xff pattern:$0x73625140] }
  0xa3   : > { %v386_v29 = vpop.f32.mrf.mxu0 }
  0xa4   : > { %v387_v31 = vadd.f32 %v386_v29, %v1179_v26 }
  0xa5   : > { %v406_v44 = vpop.f32.mrf.mxu1 }
  0xa6   : > { %v426_v32 = vadd.f32 %v424_v30, %v387_v31  ;;  %v407_v49 = vadd.f32 %v406_v44, %v1189_v41 }
  0xa8   : > { %v936_v34 = vmul.f32 -1.442695, %v426_v32 }
  0xaa   : > { %983 = vpow2.f32 %v936_v34 }
  0xb0   : > { %v984_v36 = vpop.eup %983 }
  0xb1   : > { %v430_v37 = vadd.f32 1.0, %v984_v36 }
  0xb3   : > { %985 = vrcp.f32 %v430_v37  ;;  %v442_v45 = vand.u32 2147483648, %v430_v37  ;;  %v440_v47 = vand.u32 2147483647, %v430_v37  ;;  %vm436_vm5 = vweird.f32 %v430_v37 }
  0xb5   : > { %v443_v51 = vor.u32 1.1754944e-38, %v442_v45  ;;  %vm441_vm7 = vcmp.eq.f32.partialorder %v440_v47, 8.507059e+37 }
  0xb9   : > { %v986_v39 = vpop.eup %985 }
  0xba   : > { %v432_v40 = vmul.f32 %v986_v39, %v430_v37  ;;  %vm437_vm3 = vweird.f32 %v986_v39 }
  0xbb   : > { %vm438_vm6 = vmor %vm436_vm5, %vm437_vm3 }
  0xbc   : > { %v433_v43 = vsub.f32 1.0, %v432_v40  ;;  %v621_v40 = vld.sshfl [vmem:[#allocation1] sm:$0xff pattern:$0x73625140] }
  0xbe   : > { %v434_v46 = vmul.f32 %v986_v39, %v433_v43 }
  0xc0   : > { %v435_v50 = vadd.f32 %v986_v39, %v434_v46 }
  0xc2   : > { %v439_v52 = vsel %vm438_vm6, %v986_v39, %v435_v50  ;;  %v948_v39 = vld [vmem:[%s1107_s10 + $0x4] sm:$0xf]  ;;  %v954_v50 = vld [vmem:[%s1102_s30 + $0xc] sm:$0xf]  ;;  %s1049_s30 = smov 32  }
  0xc3   : > { %v444_v54 = vsel %vm441_vm7, %v443_v51, %v439_v52  ;;  %626 = vst [vmem:[#allocation1] ss:$4 sm:$0xff] %v948_v39 }
  0xc4   : > { %v446_v55 = vmul.f32 %v444_v54, %v407_v49  ;;  %v449_v59 = vsub.f32 1.0, %v444_v54 }
  0xc6   : > { %v447_v56 = vadd.f32 %v446_v55, %v425_v53 }
  0xc8   : > { %987 = vtanh.f32 %v447_v56 }
  0xca   : > { %v627_v42 = vld.sshfl [vmem:[#allocation1] sm:$0xff pattern:$0x73625140]  ;;  %v628_v47 = vld.sshfl [vmem:[#allocation1 + $0x8] sm:$0xff pattern:$0x73625140] }
  0xcb   : > { %v631_v44 = vsel %vm1181_vm2, %v621_v40, %v627_v42  ;;  %721 = vst [vmem:[#allocation1] ss:$4 sm:$0xff] %v954_v50  ;;  %v632_v1 = vsel %vm1191_vm4, %v622_v38, %v628_v47 }
  0xce   : > { %v988_v57 = vpop.eup %987 }
  0xcf   : > { %451 = vrot.lane.b32.xlu0 %v988_v57, %s1048_s15 }
  0xd7   : > { %455 = vrot.lane.b32.xlu0 %v1162_v15, %s1048_s15 }
 0x141   : > { %v452_v58 = vpop.permute.xlu0 %451 }
 0x142   : > { %v454_v61 = vmul.f32 %v452_v58, %v449_v59 }
 0x149   : > { %v456_v60 = vpop.permute.xlu0 %455 }
 0x14a   : > { %v458_v62 = vmul.f32 %v456_v60, %v444_v54 }
 0x14c   : > { %v1201_v63 = vadd.f32 %v458_v62, %v454_v61 }
 0x14e   : > { %461 = vrot.lane.b32.xlu1 %v1201_v63, %s1048_s15 }
 0x1c0   : > { %v462_v0 = vpop.permute.xlu1 %461 }
 0x1c1   : > { %465 = vst.msk [vmem:[%s1112_s13] sm:$0x3] %vm464_vm8, %v462_v0  ;;  %938 = vmatmul.msk.f32.vlgmr.msra.gmra.mxu2 %vm365_vm1, %v462_v0  ;;  %939 = vmatmul.msk.f32.vlgmr.msra.gmra.mxu3 %vm365_vm1, %v462_v0 }
 0x244   : > { %v490_v5 = vpop.f32.mrf.mxu2  ;;  %v510_v20 = vpop.f32.mrf.mxu3 }
 0x245   : > { %v491_v7 = vadd.f32 %v490_v5, %v1179_v26  ;;  %v511_v23 = vadd.f32 %v510_v20, %v1189_v41 }
 0x247   : > { %v531_v8 = vadd.f32 %v529_v6, %v491_v7 }
 0x249   : > { %v942_v10 = vmul.f32 -1.442695, %v531_v8 }
 0x24b   : > { %989 = vpow2.f32 %v942_v10 }
 0x251   : > { %v990_v12 = vpop.eup %989 }
 0x252   : > { %v535_v13 = vadd.f32 1.0, %v990_v12 }
 0x254   : > { %991 = vrcp.f32 %v535_v13  ;;  %v547_v17 = vand.u32 2147483648, %v535_v13  ;;  %v545_v19 = vand.u32 2147483647, %v535_v13  ;;  %vm541_vm10 = vweird.f32 %v535_v13 }
 0x256   : > { %v548_v22 = vor.u32 1.1754944e-38, %v547_v17  ;;  %vm546_vm12 = vcmp.eq.f32.partialorder %v545_v19, 8.507059e+37 }
 0x25a   : > { %v992_v14 = vpop.eup %991 }
 0x25b   : > { %v537_v15 = vmul.f32 %v992_v14, %v535_v13  ;;  %vm542_vm9 = vweird.f32 %v992_v14  ;;  %v723_v13 = vld.sshfl [vmem:[#allocation1 + $0x8] sm:$0xff pattern:$0x73625140] }
 0x25c   : > { %vm543_vm11 = vmor %vm541_vm10, %vm542_vm9 }
 0x25d   : > { %v538_v16 = vsub.f32 1.0, %v537_v15  ;;  %v722_v15 = vld.sshfl [vmem:[#allocation1] sm:$0xff pattern:$0x73625140] }
 0x25f   : > { %v539_v18 = vmul.f32 %v992_v14, %v538_v16 }
 0x261   : > { %v540_v21 = vadd.f32 %v992_v14, %v539_v18 }
 0x263   : > { %v544_v24 = vsel %vm543_vm11, %v992_v14, %v540_v21  ;;  %v719_v14 = vld [vmem:[%s1107_s10] sm:$0xf] }
 0x264   : > { %v549_v28 = vsel %vm546_vm12, %v548_v22, %v544_v24  ;;  %727 = vst [vmem:[#allocation1] ss:$4 sm:$0xff] %v719_v14 }
 0x265   : > { %v551_v29 = vmul.f32 %v549_v28, %v511_v23  ;;  %v554_v32 = vsub.f32 1.0, %v549_v28  ;;  %v560_v34 = vmul.f32 %v549_v28, %v1201_v63 }
 0x267   : > { %v552_v30 = vadd.f32 %v551_v29, %v530_v25 }
 0x269   : > { %993 = vtanh.f32 %v552_v30 }
 0x26b   : > { %v728_v16 = vld.sshfl [vmem:[#allocation1] sm:$0xff pattern:$0x73625140] }
 0x26c   : > { %v732_v18 = vsel %vm1181_vm2, %v722_v15, %v728_v16 }
 0x26f   : > { %v994_v31 = vpop.eup %993 }
 0x270   : > { %556 = vrot.lane.b32.xlu1 %v994_v31, %s1048_s15 }
 0x2e2   : > { %v557_v33 = vpop.permute.xlu1 %556 }
 0x2e3   : > { %v559_v35 = vmul.f32 %v557_v33, %v554_v32  ;;  %v729_v33 = vld.sshfl [vmem:[#allocation1 + $0x8] sm:$0xff pattern:$0x73625140] }
 0x2e5   : > { %v561_v36 = vadd.f32 %v560_v34, %v559_v35 }
 0x2e7   : > { %563 = vrot.lane.b32.xlu2 %v561_v36, %s1048_s15 }
 0x341   : > { %v564_v37 = vpop.permute.xlu2 %563 }
 0x342   : > { %943 = vst.msk [vmem:[%s1112_s13 + $0x2] sm:$0x3] %vm464_vm8, %v564_v37  ;;  %945 = vmatmul.msk.f32.vlgmr.msrb.gmra.mxu0 %vm365_vm1, %v564_v37  ;;  %946 = vmatmul.msk.f32.vlgmr.msrb.gmra.mxu1 %vm365_vm1, %v564_v37 }
 0x3bf   : > { %v592_v43 = vpop.f32.mrf.mxu0  ;;  %v612_v59 = vpop.f32.mrf.mxu1 }
 0x3c0   : > { %v593_v45 = vadd.f32 %v592_v43, %v1179_v26  ;;  %v613_v62 = vadd.f32 %v612_v59, %v1189_v41 }
 0x3c2   : > { %v633_v46 = vadd.f32 %v631_v44, %v593_v45 }
 0x3c4   : > { %v949_v49 = vmul.f32 -1.442695, %v633_v46 }
 0x3c6   : > { %995 = vpow2.f32 %v949_v49 }
 0x3cc   : > { %v996_v51 = vpop.eup %995 }
 0x3cd   : > { %v637_v52 = vadd.f32 1.0, %v996_v51 }
 0x3cf   : > { %997 = vrcp.f32 %v637_v52  ;;  %v649_v56 = vand.u32 2147483648, %v637_v52  ;;  %v647_v58 = vand.u32 2147483647, %v637_v52  ;;  %vm643_vm14 = vweird.f32 %v637_v52 }
 0x3d1   : > { %v650_v61 = vor.u32 1.1754944e-38, %v649_v56  ;;  %vm648_vm0 = vcmp.eq.f32.partialorder %v647_v58, 8.507059e+37 }
 0x3d5   : > { %v998_v53 = vpop.eup %997 }
 0x3d6   : > { %v639_v54 = vmul.f32 %v998_v53, %v637_v52  ;;  %vm644_vm13 = vweird.f32 %v998_v53 }
 0x3d7   : > { %vm645_vm15 = vmor %vm643_vm14, %vm644_vm13 }
 0x3d8   : > { %v640_v55 = vsub.f32 1.0, %v639_v54 }
 0x3da   : > { %v641_v57 = vmul.f32 %v998_v53, %v640_v55 }
 0x3dc   : > { %v642_v60 = vadd.f32 %v998_v53, %v641_v57 }
 0x3de   : > { %v646_v0 = vsel %vm645_vm15, %v998_v53, %v642_v60 }
 0x3df   : > { %v651_v2 = vsel %vm648_vm0, %v650_v61, %v646_v0 }
 0x3e0   : > { %v653_v3 = vmul.f32 %v651_v2, %v613_v62  ;;  %v656_v6 = vsub.f32 1.0, %v651_v2  ;;  %v662_v8 = vmul.f32 %v651_v2, %v561_v36 }
 0x3e2   : > { %v654_v4 = vadd.f32 %v653_v3, %v632_v1 }
 0x3e4   : > { %999 = vtanh.f32 %v654_v4 }
 0x3ea   : > { %v1000_v5 = vpop.eup %999 }
 0x3eb   : > { %658 = vrot.lane.b32.xlu2 %v1000_v5, %s1048_s15 }
 0x3f3   : > { %466 = vrot.lane.b32.xlu2 %v1201_v63, %s1049_s30 }
 0x445   : > { %v659_v7 = vpop.permute.xlu2 %658 }
 0x446   : > { %v661_v9 = vmul.f32 %v659_v7, %v656_v6 }
 0x448   : > { %v663_v10 = vadd.f32 %v662_v8, %v661_v9 }
 0x44a   : > { %665 = vrot.lane.b32.xlu0 %v663_v10, %s1048_s15 }
 0x44d   : > { %v467_v11 = vpop.permute.xlu2 %466 }
 0x44e   : > { %937 = vst.msk [vmem:[%s1117_s17 + $0x6] sm:$0x3] %vm464_vm8, %v467_v11 }
 0x452   : > { %568 = vrot.lane.b32.xlu0 %v561_v36, %s1049_s30  ;;  %v733_v36 = vsel %vm1191_vm4, %v723_v13, %v729_v33  ;;  %vm775_vm4 = vcmask 517120  }
 0x4bc   : > { %v666_v12 = vpop.permute.xlu0 %665 }
 0x4bd   : > { %950 = vst.msk [vmem:[%s1112_s13 + $0x4] sm:$0x3] %vm464_vm8, %v666_v12  ;;  %952 = vmatmul.msk.f32.vlgmr.msrb.gmra.mxu2 %vm365_vm1, %v666_v12  ;;  %953 = vmatmul.msk.f32.vlgmr.msrb.gmra.mxu3 %vm365_vm1, %v666_v12 }
 0x4c4   : > { %v569_v63 = vpop.permute.xlu0 %568 }
 0x4c5   : > { %944 = vst.msk [vmem:[%s1117_s17 + $0x4] sm:$0x3] %vm464_vm8, %v569_v63 }
 0x540   : > { %v694_v17 = vpop.f32.mrf.mxu2  ;;  %v714_v32 = vpop.f32.mrf.mxu3 }
 0x541   : > { %v695_v19 = vadd.f32 %v694_v17, %v1179_v26  ;;  %v715_v26 = vadd.f32 %v714_v32, %v1189_v41 }
 0x543   : > { %v734_v20 = vadd.f32 %v732_v18, %v695_v19 }
 0x545   : > { %v955_v21 = vmul.f32 -1.442695, %v734_v20 }
 0x547   : > { %1001 = vpow2.f32 %v955_v21 }
 0x54d   : > { %v1002_v22 = vpop.eup %1001 }
 0x54e   : > { %v738_v23 = vadd.f32 1.0, %v1002_v22 }
 0x550   : > { %1003 = vrcp.f32 %v738_v23  ;;  %v750_v29 = vand.u32 2147483648, %v738_v23  ;;  %v748_v31 = vand.u32 2147483647, %v738_v23  ;;  %vm744_vm3 = vweird.f32 %v738_v23 }
 0x552   : > { %v751_v27 = vor.u32 1.1754944e-38, %v750_v29  ;;  %vm749_vm5 = vcmp.eq.f32.partialorder %v748_v31, 8.507059e+37 }
 0x556   : > { %v1004_v24 = vpop.eup %1003 }
 0x557   : > { %v740_v25 = vmul.f32 %v1004_v24, %v738_v23  ;;  %vm745_vm1 = vweird.f32 %v1004_v24 }
 0x558   : > { %vm746_vm2 = vmor %vm744_vm3, %vm745_vm1 }
 0x559   : > { %v741_v28 = vsub.f32 1.0, %v740_v25 }
 0x55b   : > { %v742_v30 = vmul.f32 %v1004_v24, %v741_v28 }
 0x55d   : > { %v743_v34 = vadd.f32 %v1004_v24, %v742_v30 }
 0x55f   : > { %v747_v35 = vsel %vm746_vm2, %v1004_v24, %v743_v34 }
 0x560   : > { %v752_v37 = vsel %vm749_vm5, %v751_v27, %v747_v35 }
 0x561   : > { %v754_v38 = vmul.f32 %v752_v37, %v715_v26  ;;  %v757_v42 = vsub.f32 1.0, %v752_v37  ;;  %v763_v41 = vmul.f32 %v752_v37, %v663_v10 }
 0x563   : > { %v755_v39 = vadd.f32 %v754_v38, %v733_v36 }
 0x565   : > { %1005 = vtanh.f32 %v755_v39 }
 0x56b   : > { %v1006_v40 = vpop.eup %1005 }
 0x56c   : > { %759 = vrot.lane.b32.xlu1 %v1006_v40, %s1048_s15 }
 0x574   : > { %670 = vrot.lane.b32.xlu1 %v663_v10, %s1049_s30 }
 0x5de   : > { %v760_v43 = vpop.permute.xlu1 %759 }
 0x5df   : > { %v762_v44 = vmul.f32 %v760_v43, %v757_v42 }
 0x5e1   : > { %v764_v45 = vadd.f32 %v763_v41, %v762_v44 }
 0x5e3   : > { %771 = vrot.lane.b32.xlu0 %v764_v45, %s1049_s30  ;;  %766 = vrot.lane.b32.xlu2 %v764_v45, %s1048_s15 }
 0x5e6   : > { %v671_v48 = vpop.permute.xlu1 %670 }
 0x5e7   : > { %951 = vst.msk [vmem:[%s1117_s17 + $0x2] sm:$0x3] %vm464_vm8, %v671_v48 }
 0x63d   : > { %v767_v46 = vpop.permute.xlu2 %766 }
 0x63e   : > { %956 = vst.msk [vmem:[%s1112_s13 + $0x6] sm:$0x3] %vm464_vm8, %v767_v46 }
 0x63f   : > { %776 = vst.msk [vmem:[#allocation2] sm:$0x3] %vm775_vm4, %v767_v46 }
 0x652   : > { %780 = sbr.rel (%p957_p6) target bundleno = 1625 (0x659), region = 44 }
 0x655   : > { %v772_v47 = vpop.permute.xlu0 %771 }
 0x656   : > { %774 = vst.msk [vmem:[%s1117_s17] sm:$0x3] %vm464_vm8, %v772_v47 }
 0x657   : > { %781 = vst.msk [vmem:[#allocation3] sm:$0x3] %vm464_vm8, %v767_v46 }
 0x658   : > { %783 = vst.msk [vmem:[#allocation3 + $0x2] sm:$0x3] %vm464_vm8, %v772_v47 }
 0x659 PF: > { %p968_p7 = scmp.eq.s32.totalorder %s1093_s22, 1  ;;  %s1050_s10 = smov [#allocation3]  }
 0x65a   : > { %s809_s16 = sshll.u32 %s1050_s10, 4  ;;  %s811_s13 = sshll.u32 %s1280_s6, 4  ;;  %s810_s16 = int_to_ptr.vmem [resolvable:$true] %s809_s16  ;;  %s812_s13 = int_to_ptr.hbm [resolvable:$true] %s811_s13 }
 0x65b   : > { %s1051_s20 = smov 2  }
 0x65c   : > { %965 = dma.vmem_to_hbm [thread:$0]  (%p968_p7), %s810_s16, 64, %s812_s13, [#allocation4], %s1049_s30, %s1049_s30, %s1051_s20  }
 0x65d   : > { %1040 = dma.done.wait (%p968_p7), [#allocation4], 64  }
 0x65e   : > { %1042 = vsyncadd (%p968_p7), [#allocation4], 4294967232 }
 0x65f PF: > { %s18_s21 = sadd.s32 1, %s1045_s21  }
 0x660   : > { %p15_p8 = scmp.ge.s32.totalorder %s18_s21, 4  }
 0x662   :  { %17 = sbr.rel (!%p15_p8) target bundleno = 1 (0x1), region = 111 }
 0x667   :  { %845 = vsyncpa [#allocation4], 1 }
 0x668   :  { %847 = vsyncpa [#allocation4 + $0x1], 1 }

</bundles_post_ra>
